<compile_context>
chip_gen: v7x
topology: tpu7x:2x2x1
jax: 0.10.0
libtpu: 0.0.40
codegen_flags: <defaults>
</compile_context>

<pallas_src>
import functools
import math

import jax
import jax.numpy as jnp
from jax.experimental import pallas as pl
from jax.experimental.pallas import tpu as pltpu


def _round_up(x, m):
    return (x + m - 1) // m * m


def _fused_mlp_kernel(x_ref, *refs):
    """Chain of affine layers on one batch tile, all intermediates kept on-chip.

    refs = (w0, b0, w1, b1, ..., w_{L-1}, b_{L-1}, out_ref)
    """
    num_layers = (len(refs) - 1) // 2
    out_ref = refs[-1]

    h = x_ref[...]
    for l in range(num_layers):
        w = refs[2 * l][...]
        b = refs[2 * l + 1][...]
        # MXU matmul in the parameter dtype, f32 accumulation, bias add in f32.
        acc = jnp.dot(h.astype(w.dtype), w, preferred_element_type=jnp.float32)
        h = acc + b.astype(jnp.float32)
    out_ref[...] = h.astype(out_ref.dtype)


def init_blondnet_mlp_params(key, seq_len, in_features, num_classes, num_layers):
    """Deterministic init mirroring nn.Linear default (uniform +-1/sqrt(fan_in)).

    Returns list of (w_t, b) with w_t already transposed to (in, out).
    """
    params = []
    in_size = in_features * seq_len
    dims = []
    for _ in range(1, num_layers):
        dims.append((in_size, in_size // 2))
        in_size = in_size // 2
    dims.append((in_size, num_classes))

    for (fan_in, fan_out) in dims:
        key, kw, kb = jax.random.split(key, 3)
        bound = 1.0 / math.sqrt(fan_in)
        w_t = jax.random.uniform(kw, (fan_in, fan_out), jnp.float32, -bound, bound)
        b = jax.random.uniform(kb, (1, fan_out), jnp.float32, -bound, bound)
        params.append((w_t, b))
    return params


def prepare_params(params, lane=128):
    """Zero-pad the final layer's output dim to a lane-dense multiple of 128 and
    flatten to (w0, b0, w1, b1, ...). Zero padding keeps numerics exact after the
    wrapper slices the output back to num_classes."""
    flat = []
    last = len(params) - 1
    for idx, (w_t, b) in enumerate(params):
        if idx == last:
            out_pad = _round_up(w_t.shape[1], lane)
            pad = out_pad - w_t.shape[1]
            if pad:
                w_t = jnp.pad(w_t, ((0, 0), (0, pad)))
                b = jnp.pad(b, ((0, 0), (0, pad)))
        flat.append(w_t)
        flat.append(b)
    return tuple(flat)


@functools.partial(jax.jit, static_argnames=("num_classes", "block_b"))
def blondnet_mlp_forward(x, flat_params, *, num_classes, block_b=256):
    batch, in_size = x.shape
    out_pad = flat_params[-2].shape[1]  # lane-padded class count (multiple of 128)

    # Batch tile: multiple of 8 sublanes, capped at block_b rows (pipelined over grid).
    tile_b = min(block_b, _round_up(batch, 8))
    padded_batch = _round_up(batch, tile_b)
    if padded_batch != batch:
        x = jnp.pad(x, ((0, padded_batch - batch), (0, 0)))
    grid = (padded_batch // tile_b,)

    # Activation tile streams over the batch grid; weights/biases are resident
    # (constant index_map -> fetched once, reused across all batch tiles).
    in_specs = [pl.BlockSpec((tile_b, in_size), lambda i: (i, 0))]
    for p in flat_params:
        in_specs.append(pl.BlockSpec(p.shape, lambda i: (0, 0)))
    out_specs = pl.BlockSpec((tile_b, out_pad), lambda i: (i, 0))

    # Deliberate VMEM budget: resident params + double-buffered in/out tiles
    # + intermediate activations, with headroom. Clamped so the same plan is
    # sane on v7x's 64 MiB physical VMEM.
    itemsize = x.dtype.itemsize
    resident = sum(int(p.size) * p.dtype.itemsize for p in flat_params)
    streamed = 2 * tile_b * (in_size + out_pad) * itemsize
    widest = max(int(p.shape[1]) for p in flat_params[::2])
    intermediates = 4 * tile_b * widest * 4  # f32 accumulators / spill slack
    vmem_limit = int(1.5 * (resident + streamed + intermediates)) + (4 << 20)
    vmem_limit = max(16 << 20, min(vmem_limit, 100 << 20))

    out = pl.pallas_call(
        _fused_mlp_kernel,
        out_shape=jax.ShapeDtypeStruct((padded_batch, out_pad), x.dtype),
        grid=grid,
        in_specs=in_specs,
        out_specs=out_specs,
        compiler_params=pltpu.CompilerParams(
            dimension_semantics=("parallel",),  # megacore sharding on v7x
            vmem_limit_bytes=vmem_limit,
        ),
    )(x, *flat_params)

    return out[:batch, :num_classes]


if __name__ == "__main__":
    # Small, self-consistent shapes: seq_len=8, in_features=32 -> in_size=256
    # num_layers=3: Linear(256,128) -> Linear(128,64) -> Linear(64,10)
    seq_len, in_features, num_classes, num_layers = 8, 32, 10, 3
    batch = 2

    key = jax.random.PRNGKey(0)
    key, kx = jax.random.split(key)
    x = jax.random.normal(kx, (batch, seq_len * in_features), jnp.float32)

    params = init_blondnet_mlp_params(key, seq_len, in_features,
                                      num_classes, num_layers)
    flat_params = prepare_params(params)

    out = blondnet_mlp_forward(x, flat_params, num_classes=num_classes)
    out = jax.block_until_ready(out)

    # Sanity check against pure-JAX reference (unpadded params).
    ref = x
    for (w_t, b) in params:
        ref = ref @ w_t + b
    assert out.shape == (batch, num_classes)
    assert jnp.allclose(out, ref, atol=1e-4, rtol=1e-4)

    # TODO(synk): for v6e/v7x throughput, cast x and weights to bf16 in the
    # wrapper (kernel already accumulates in f32) and loosen the tolerance.
    print("KERNEL_OK")
</pallas_src>

<mosaic_0001>
module attributes {stable_mosaic.version = 11 : i64} {
  func.func @_fused_mlp_kernel(%arg0: i32, %arg1: memref<8x256xf32, #tpu.memory_space<vmem>>, %arg2: memref<256x128xf32, #tpu.memory_space<vmem>>, %arg3: memref<1x128xf32, #tpu.memory_space<vmem>>, %arg4: memref<128x64xf32, #tpu.memory_space<vmem>>, %arg5: memref<1x64xf32, #tpu.memory_space<vmem>>, %arg6: memref<64x128xf32, #tpu.memory_space<vmem>>, %arg7: memref<1x128xf32, #tpu.memory_space<vmem>>, %arg8: memref<8x128xf32, #tpu.memory_space<vmem>>) attributes {dimension_semantics = [#tpu.dimension_semantics<parallel>], iteration_bounds = array<i64: 1>, scalar_prefetch = 0 : i64, scratch_operands = 0 : i64, tpu.core_type = #tpu.core_type<tc>, window_params = [{transform_indices = @transform_0, window_bounds = array<i64: 8, 256>}, {pipeline_mode = #tpu.pipeline_mode<synchronous>, transform_indices = @transform_1, window_bounds = array<i64: 256, 128>}, {pipeline_mode = #tpu.pipeline_mode<synchronous>, transform_indices = @transform_2, window_bounds = array<i64: 1, 128>}, {pipeline_mode = #tpu.pipeline_mode<synchronous>, transform_indices = @transform_3, window_bounds = array<i64: 128, 64>}, {pipeline_mode = #tpu.pipeline_mode<synchronous>, transform_indices = @transform_4, window_bounds = array<i64: 1, 64>}, {pipeline_mode = #tpu.pipeline_mode<synchronous>, transform_indices = @transform_5, window_bounds = array<i64: 64, 128>}, {pipeline_mode = #tpu.pipeline_mode<synchronous>, transform_indices = @transform_6, window_bounds = array<i64: 1, 128>}, {transform_indices = @transform_7, window_bounds = array<i64: 8, 128>}]} {
    %c0 = arith.constant 0 : index
    %c0_0 = arith.constant 0 : index
    %0 = vector.load %arg1[%c0, %c0_0] : memref<8x256xf32, #tpu.memory_space<vmem>>, vector<8x256xf32>
    %c0_1 = arith.constant 0 : index
    %c0_2 = arith.constant 0 : index
    %1 = vector.load %arg2[%c0_1, %c0_2] : memref<256x128xf32, #tpu.memory_space<vmem>>, vector<256x128xf32>
    %c0_3 = arith.constant 0 : index
    %c0_4 = arith.constant 0 : index
    %2 = vector.load %arg3[%c0_3, %c0_4] : memref<1x128xf32, #tpu.memory_space<vmem>>, vector<1x128xf32>
    %cst = arith.constant dense<0.000000e+00> : vector<8x128xf32>
    %3 = tpu.matmul %0, %1, %cst {dimension_numbers = #tpu.dot_dimension_numbers<[1], [0], [0], [1], [0, 0, 1, 1], [], []>} : vector<8x256xf32>, vector<256x128xf32>, vector<8x128xf32> -> vector<8x128xf32>
    %4 = vector.broadcast %2 : vector<1x128xf32> to vector<8x128xf32>
    %5 = arith.addf %3, %4 : vector<8x128xf32>
    %c0_5 = arith.constant 0 : index
    %c0_6 = arith.constant 0 : index
    %6 = vector.load %arg4[%c0_5, %c0_6] : memref<128x64xf32, #tpu.memory_space<vmem>>, vector<128x64xf32>
    %c0_7 = arith.constant 0 : index
    %c0_8 = arith.constant 0 : index
    %7 = vector.load %arg5[%c0_7, %c0_8] : memref<1x64xf32, #tpu.memory_space<vmem>>, vector<1x64xf32>
    %cst_9 = arith.constant dense<0.000000e+00> : vector<8x64xf32>
    %8 = tpu.matmul %5, %6, %cst_9 {dimension_numbers = #tpu.dot_dimension_numbers<[1], [0], [0], [1], [0, 0, 1, 1], [], []>} : vector<8x128xf32>, vector<128x64xf32>, vector<8x64xf32> -> vector<8x64xf32>
    %9 = vector.broadcast %7 : vector<1x64xf32> to vector<8x64xf32>
    %10 = arith.addf %8, %9 : vector<8x64xf32>
    %c0_10 = arith.constant 0 : index
    %c0_11 = arith.constant 0 : index
    %11 = vector.load %arg6[%c0_10, %c0_11] : memref<64x128xf32, #tpu.memory_space<vmem>>, vector<64x128xf32>
    %c0_12 = arith.constant 0 : index
    %c0_13 = arith.constant 0 : index
    %12 = vector.load %arg7[%c0_12, %c0_13] : memref<1x128xf32, #tpu.memory_space<vmem>>, vector<1x128xf32>
    %cst_14 = arith.constant dense<0.000000e+00> : vector<8x128xf32>
    %13 = tpu.matmul %10, %11, %cst_14 {dimension_numbers = #tpu.dot_dimension_numbers<[1], [0], [0], [1], [0, 0, 1, 1], [], []>} : vector<8x64xf32>, vector<64x128xf32>, vector<8x128xf32> -> vector<8x128xf32>
    %14 = vector.broadcast %12 : vector<1x128xf32> to vector<8x128xf32>
    %15 = arith.addf %13, %14 : vector<8x128xf32>
    %c0_15 = arith.constant 0 : index
    %c0_16 = arith.constant 0 : index
    %16 = vector.load %arg8[%c0_15, %c0_16] : memref<8x128xf32, #tpu.memory_space<vmem>>, vector<8x128xf32>
    tpu.vector_store %arg8[%c0_15, %c0_16], %15 {strides = array<i32>} : memref<8x128xf32, #tpu.memory_space<vmem>>, vector<8x128xf32>,
    return
  }
  func.func @transform_0(%arg0: i32) -> (i32, i32) {
    %c0_i32 = arith.constant 0 : i32
    %c0_i32_0 = arith.constant 0 : i32
    return %arg0, %c0_i32 : i32, i32
  }
  func.func @transform_1(%arg0: i32) -> (i32, i32) {
    %c0_i32 = arith.constant 0 : i32
    %c0_i32_0 = arith.constant 0 : i32
    %c0_i32_1 = arith.constant 0 : i32
    return %c0_i32, %c0_i32_0 : i32, i32
  }
  func.func @transform_2(%arg0: i32) -> (i32, i32) {
    %c0_i32 = arith.constant 0 : i32
    %c0_i32_0 = arith.constant 0 : i32
    %c0_i32_1 = arith.constant 0 : i32
    return %c0_i32, %c0_i32_0 : i32, i32
  }
  func.func @transform_3(%arg0: i32) -> (i32, i32) {
    %c0_i32 = arith.constant 0 : i32
    %c0_i32_0 = arith.constant 0 : i32
    %c0_i32_1 = arith.constant 0 : i32
    return %c0_i32, %c0_i32_0 : i32, i32
  }
  func.func @transform_4(%arg0: i32) -> (i32, i32) {
    %c0_i32 = arith.constant 0 : i32
    %c0_i32_0 = arith.constant 0 : i32
    %c0_i32_1 = arith.constant 0 : i32
    return %c0_i32, %c0_i32_0 : i32, i32
  }
  func.func @transform_5(%arg0: i32) -> (i32, i32) {
    %c0_i32 = arith.constant 0 : i32
    %c0_i32_0 = arith.constant 0 : i32
    %c0_i32_1 = arith.constant 0 : i32
    return %c0_i32, %c0_i32_0 : i32, i32
  }
  func.func @transform_6(%arg0: i32) -> (i32, i32) {
    %c0_i32 = arith.constant 0 : i32
    %c0_i32_0 = arith.constant 0 : i32
    %c0_i32_1 = arith.constant 0 : i32
    return %c0_i32, %c0_i32_0 : i32, i32
  }
  func.func @transform_7(%arg0: i32) -> (i32, i32) {
    %c0_i32 = arith.constant 0 : i32
    %c0_i32_0 = arith.constant 0 : i32
    return %arg0, %c0_i32 : i32, i32
  }
}

</mosaic_0001>

<bundles_post_ra>
// kernel: blondnet_mlp_forward.1
= control target key start
LH: loop header
LB: loop body
LE: loop exit
PB: predicated region body
PF: predicated region fallthrough
CT: control target
= control target key end

     0   :  { %12 = vsyncpa [#allocation3], 0  ;;  %s556_s24 = smov [#allocation2]   ;;  %s716_s0 = inlined_call_operand.vmem [shape: f32[8,256], index: 0, kind: input, shape index: {}]   ;;  %s717_s1 = inlined_call_operand.hbm [shape: f32[256,128], index: 1, kind: input, shape index: {}]   ;;  %s718_s2 = inlined_call_operand.vmem [shape: f32[1,128], index: 2, kind: input, shape index: {}]   ;;  %s719_s3 = inlined_call_operand.vmem [shape: f32[128,64], index: 3, kind: input, shape index: {}]   ;;  %s720_s4 = inlined_call_operand.vmem [shape: f32[1,64], index: 4, kind: input, shape index: {}]   ;;  %s721_s5 = inlined_call_operand.vmem [shape: f32[64,128], index: 5, kind: input, shape index: {}]   ;;  %s722_s6 = inlined_call_operand.vmem [shape: f32[1,128], index: 6, kind: input, shape index: {}]   ;;  %s723_s7 = inlined_call_operand.vmem [shape: f32[8,128], index: 7, kind: output, shape index: {}]  }
   0x1   :  { %s20_s25 = sshll.u32 %s556_s24, 4  ;;  %s532_s28 = scalar_lea.hbm %s717_s1, 4096  ;;  %s21_s25 = int_to_ptr.vmem [resolvable:$true] %s20_s25 }
   0x2   :  { %p533_p0 = scmp.ne.s32.totalorder %s717_s1, %s532_s28  ;;  %p536_p1 = scmp.lt.u32.totalorder %s532_s28, %s717_s1 }
   0x4   :  { %p538_p2 = pnand %p536_p1, %p533_p0 }
   0x6   :  { %541 = shalt.err (!%p538_p2)
}
   0x7   :  { %s542_s10 = scalar_lea.vmem %s21_s25, 4096  ;;  %p547_p4 = scmp.lt.s32.totalorder %s21_s25, %s21_s25 }
   0x8   :  { %p543_p3 = scmp.ne.s32.totalorder %s21_s25, %s542_s10  ;;  %p548_p5 = scmp.lt.s32.totalorder %s542_s10, %s542_s10 }
   0xa   :  { %p549_p6 = por %p548_p5, %p547_p4 }
   0xc   :  { %p550_p7 = pnand %p549_p6, %p543_p3 }
   0xe   :  { %553 = shalt.err (!%p550_p7)
}
   0xf   :  { %s557_s11 = smov 128   ;;  %s558_s12 = smov 8  }
  0x10   :  { %26 = dma.hbm_to_vmem [thread:$0]  %s717_s1, 4096, %s21_s25, [#allocation3], %s557_s11, %s557_s11, %s558_s12  }
  0x11   :  { %554 = dma.done.wait [#allocation3], 4096  }
  0x12   :  { %555 = vsyncadd [#allocation3], 4294963200  ;;  %v559_v0 = vmov 0.0|0.0   ;;  %v58_v1 = vld [vmem:[#allocation2 + $0x80] sm:$0xff]  ;;  %v59_v2 = vld [vmem:[#allocation2 + $0x88] sm:$0xff]  ;;  %vm560_vm0 = vmmov 0  }
  0x13   :  { %490 = vmatprep.subr.bf16.mxu1 %v559_v0  ;;  %v42_v3 = vld [vmem:[#allocation2] sm:$0xff]  ;;  %v458_v4 = vpack.c.bf16 %v59_v2, %v58_v1  ;;  %v43_v5 = vld [vmem:[#allocation2 + $0x8] sm:$0xff]  ;;  %v60_v6 = vld [vmem:[#allocation2 + $0x90] sm:$0xff]  ;;  %vm259_vm1 = vcmask 523264  }
  0x14   :  { %v61_v7 = vld [vmem:[#allocation2 + $0x98] sm:$0xff]  ;;  %v460_v8 = vpack.c.bf16 %v43_v5, %v42_v3  ;;  %v44_v10 = vld [vmem:[#allocation2 + $0x10] sm:$0xff]  ;;  %v62_v12 = vld [vmem:[#allocation2 + $0xa0] sm:$0xff] }
  0x15   :  { %v462_v9 = vpack.c.bf16 %v61_v7, %v60_v6  ;;  %v45_v11 = vld [vmem:[#allocation2 + $0x18] sm:$0xff]  ;;  %459 = vmatprep.subr.bf16.mxu0 %v458_v4  ;;  %v63_v13 = vld [vmem:[#allocation2 + $0xa8] sm:$0xff]  ;;  %v46_v16 = vld [vmem:[#allocation2 + $0x20] sm:$0xff] }
  0x16   :  { %461 = vmatpush3.bf16.msra.mxu0 %v460_v8  ;;  %v464_v14 = vpack.c.bf16 %v45_v11, %v44_v10  ;;  %v466_v15 = vpack.c.bf16 %v63_v13, %v62_v12  ;;  %v47_v17 = vld [vmem:[#allocation2 + $0x28] sm:$0xff]  ;;  %v64_v18 = vld [vmem:[#allocation2 + $0xb0] sm:$0xff]  ;;  %v65_v19 = vld [vmem:[#allocation2 + $0xb8] sm:$0xff]  ;;  %v561_v12 = vmov 0.0  }
  0x17   :  { %463 = vmatprep.subr.bf16.mxu0 %v462_v9  ;;  %v468_v20 = vpack.c.bf16 %v47_v17, %v46_v16  ;;  %v470_v21 = vpack.c.bf16 %v65_v19, %v64_v18  ;;  %v48_v22 = vld [vmem:[#allocation2 + $0x30] sm:$0xff]  ;;  %v49_v23 = vld [vmem:[#allocation2 + $0x38] sm:$0xff]  ;;  %v66_v24 = vld [vmem:[#allocation2 + $0xc0] sm:$0xff]  ;;  %436 = vmatprep.mubr.msk.f32.mxu1 %vm560_vm0, %v561_v12 }
  0x18   :  { %v67_v25 = vld [vmem:[#allocation2 + $0xc8] sm:$0xff]  ;;  %v151_v27 = vld [vmem:[%s719_s3] sm:$0xff]  ;;  %v472_v29 = vpack.c.bf16 %v49_v23, %v48_v22  ;;  %v153_v31 = vld [vmem:[%s719_s3 + $0x10] sm:$0xff] }
  0x19   :  { %v41_v26 = vld [vmem:[%s716_s0 + $0x8] sm:$0xff]  ;;  %v154_v32 = vld [vmem:[%s719_s3 + $0x18] sm:$0xff]  ;;  %v474_v33 = vpack.c.bf16 %v67_v25, %v66_v24  ;;  %v50_v34 = vld [vmem:[#allocation2 + $0x40] sm:$0xff] }
  0x1a   :  { %465 = vmatpush3.bf16.msra.mxu0 %v464_v14  ;;  %145 = vmatprep.mubr.f32.mxu0 %v41_v26  ;;  %v152_v28 = vld [vmem:[%s719_s3 + $0x8] sm:$0xff]  ;;  %v68_v36 = vld [vmem:[#allocation2 + $0xd0] sm:$0xff]  ;;  %v69_v37 = vld [vmem:[#allocation2 + $0xd8] sm:$0xff]  ;;  %v494_v38 = vpack.c.bf16 %v154_v32, %v153_v31 }
  0x1b   :  { %467 = vmatprep.subr.bf16.mxu0 %v466_v15  ;;  %v491_v30 = vpack.c.bf16 %v152_v28, %v151_v27  ;;  %v51_v35 = vld [vmem:[#allocation2 + $0x48] sm:$0xff]  ;;  %v155_v39 = vld [vmem:[%s719_s3 + $0x20] sm:$0xff]  ;;  %v478_v42 = vpack.c.bf16 %v69_v37, %v68_v36  ;;  %v52_v43 = vld [vmem:[#allocation2 + $0x50] sm:$0xff] }
  0x1c   :  { %v156_v40 = vld [vmem:[%s719_s3 + $0x28] sm:$0xff]  ;;  %v476_v41 = vpack.c.bf16 %v51_v35, %v50_v34  ;;  %v53_v44 = vld [vmem:[#allocation2 + $0x58] sm:$0xff]  ;;  %v70_v45 = vld [vmem:[#allocation2 + $0xe0] sm:$0xff] }
  0x1d   :  { %492 = vmatpush3.bf16.msra.mxu1 %v491_v30  ;;  %v71_v46 = vld [vmem:[#allocation2 + $0xe8] sm:$0xff]  ;;  %v497_v47 = vpack.c.bf16 %v156_v40, %v155_v39  ;;  %v157_v48 = vld [vmem:[%s719_s3 + $0x30] sm:$0xff]  ;;  %v158_v49 = vld [vmem:[%s719_s3 + $0x38] sm:$0xff]  ;;  %v480_v50 = vpack.c.bf16 %v53_v44, %v52_v43 }
  0x1e   :  { %469 = vmatpush3.bf16.msra.mxu0 %v468_v20  ;;  %493 = vmatprep.subr.bf16.mxu1 %v559_v0  ;;  %v482_v51 = vpack.c.bf16 %v71_v46, %v70_v45  ;;  %v54_v52 = vld [vmem:[#allocation2 + $0x60] sm:$0xff]  ;;  %v55_v53 = vld [vmem:[#allocation2 + $0x68] sm:$0xff]  ;;  %v72_v54 = vld [vmem:[#allocation2 + $0xf0] sm:$0xff]  ;;  %v500_v56 = vpack.c.bf16 %v158_v49, %v157_v48 }
  0x1f   :  { %471 = vmatprep.subr.bf16.mxu0 %v470_v21  ;;  %v73_v55 = vld [vmem:[#allocation2 + $0xf8] sm:$0xff]  ;;  %v159_v57 = vld [vmem:[%s719_s3 + $0x40] sm:$0xff]  ;;  %v160_v58 = vld [vmem:[%s719_s3 + $0x48] sm:$0xff]  ;;  %v484_v59 = vpack.c.bf16 %v55_v53, %v54_v52 }
  0x20   :  { %v486_v60 = vpack.c.bf16 %v73_v55, %v72_v54  ;;  %v56_v61 = vld [vmem:[#allocation2 + $0x70] sm:$0xff]  ;;  %v57_v62 = vld [vmem:[#allocation2 + $0x78] sm:$0xff]  ;;  %v503_v63 = vpack.c.bf16 %v160_v58, %v159_v57  ;;  %v163_v5 = vld [vmem:[%s719_s3 + $0x60] sm:$0xff] }
  0x21   :  { %495 = vmatpush3.bf16.msra.mxu1 %v494_v38  ;;  %v161_v1 = vld [vmem:[%s719_s3 + $0x50] sm:$0xff]  ;;  %v162_v2 = vld [vmem:[%s719_s3 + $0x58] sm:$0xff]  ;;  %v488_v3 = vpack.c.bf16 %v57_v62, %v56_v61  ;;  %v164_v6 = vld [vmem:[%s719_s3 + $0x68] sm:$0xff] }
  0x22   :  { %473 = vmatpush3.bf16.msra.mxu0 %v472_v29  ;;  %496 = vmatprep.subr.bf16.mxu1 %v559_v0  ;;  %v506_v4 = vpack.c.bf16 %v162_v2, %v161_v1  ;;  %v40_v7 = vld [vmem:[%s716_s0] sm:$0xff]  ;;  %v509_v8 = vpack.c.bf16 %v164_v6, %v163_v5  ;;  %v165_v9 = vld [vmem:[%s719_s3 + $0x70] sm:$0xff]  ;;  %v166_v10 = vld [vmem:[%s719_s3 + $0x78] sm:$0xff] }
  0x23   :  { %475 = vmatprep.subr.bf16.mxu0 %v474_v33  ;;  %v512_v11 = vpack.c.bf16 %v166_v10, %v165_v9  ;;  %v244_v13 = vld [vmem:[%s721_s5] sm:$0xff]  ;;  %v245_v14 = vld [vmem:[%s721_s5 + $0x8] sm:$0xff]  ;;  %v246_v15 = vld [vmem:[%s721_s5 + $0x10] sm:$0xff] }
  0x24   :  { %v515_v16 = vpack.c.bf16 %v245_v14, %v244_v13  ;;  %v247_v17 = vld [vmem:[%s721_s5 + $0x18] sm:$0xff]  ;;  %v248_v19 = vld [vmem:[%s721_s5 + $0x20] sm:$0xff]  ;;  %v249_v20 = vld [vmem:[%s721_s5 + $0x28] sm:$0xff] }
  0x25   :  { %498 = vmatpush3.bf16.msra.mxu1 %v497_v47  ;;  %v518_v18 = vpack.c.bf16 %v247_v17, %v246_v15  ;;  %v521_v21 = vpack.c.bf16 %v249_v20, %v248_v19  ;;  %v339_v23 = vld [vmem:[%s718_s2] ss:$0 sm:$0xff]  ;;  %v250_v27 = vld [vmem:[%s721_s5 + $0x30] sm:$0xff]  ;;  %v251_v28 = vld [vmem:[%s721_s5 + $0x38] sm:$0xff] }
  0x26   :  { %477 = vmatpush3.bf16.msra.mxu0 %v476_v41  ;;  %499 = vmatprep.subr.bf16.mxu1 %v559_v0  ;;  %v524_v29 = vpack.c.bf16 %v251_v28, %v250_v27  ;;  %v341_v33 = vld [vmem:[%s722_s6] ss:$0 sm:$0xff] }
  0x27   :  { %479 = vmatprep.subr.bf16.mxu0 %v478_v42 }
  0x29   :  { %501 = vmatpush3.bf16.msra.mxu1 %v500_v56 }
  0x2a   :  { %481 = vmatpush3.bf16.msra.mxu0 %v480_v50  ;;  %502 = vmatprep.subr.bf16.mxu1 %v559_v0 }
  0x2b   :  { %483 = vmatprep.subr.bf16.mxu0 %v482_v51 }
  0x2d   :  { %504 = vmatpush3.bf16.msra.mxu1 %v503_v63 }
  0x2e   :  { %485 = vmatpush3.bf16.msra.mxu0 %v484_v59  ;;  %505 = vmatprep.subr.bf16.mxu1 %v559_v0 }
  0x2f   :  { %487 = vmatprep.subr.bf16.mxu0 %v486_v60 }
  0x31   :  { %507 = vmatpush3.bf16.msra.mxu1 %v506_v4 }
  0x32   :  { %489 = vmatpush3.bf16.msra.mxu0 %v488_v3  ;;  %508 = vmatprep.subr.bf16.mxu1 %v559_v0 }
  0x33   :  { %514 = vmatprep.subr.bf16.mxu0 %v559_v0 }
  0x35   :  { %146 = vmatmul.mubr.f32.vlgmr.msra.gmra.mrb[0].mxu0 %v40_v7  ;;  %510 = vmatpush3.bf16.msra.mxu1 %v509_v8 }
  0x36   :  { %511 = vmatprep.subr.bf16.mxu1 %v559_v0  ;;  %455 = vmatprep.mubr.msk.f32.mxu0 %vm560_vm0, %v561_v12 }
  0x37   :  { %516 = vmatpush3.bf16.msra.mxu0 %v515_v16 }
  0x38   :  { %517 = vmatprep.subr.bf16.mxu0 %v559_v0 }
  0x39   :  { %513 = vmatpush3.bf16.msra.mxu1 %v512_v11 }
  0x3b   :  { %519 = vmatpush3.bf16.msra.mxu0 %v518_v18 }
  0x3c   :  { %520 = vmatprep.subr.bf16.mxu0 %v559_v0 }
  0x3f   :  { %522 = vmatpush3.bf16.msra.mxu0 %v521_v21 }
  0x40   :  { %523 = vmatprep.subr.bf16.mxu0 %v559_v0  ;;  %v340_v0 = vld [vmem:[%s720_s4] ss:$0 sm:$0xff] }
  0x43   :  { %525 = vmatpush3.bf16.msra.mxu0 %v524_v29 }
 0x108   :  { %v375_v22 = vpop.f32.mrb[0].mxu0 }
 0x109   :  { %v376_v24 = vpop.f32.mrb[1].mxu0 }
 0x10a   :  { %v377_v25 = vadd.f32 %v376_v24, %v375_v22 }
 0x10c   :  { %v148_v26 = vadd.f32 %v377_v25, %v339_v23 }
 0x10e   :  { %437 = vmatmul.mubr.f32.vlgmr.msra.gmra.mrb[0].mxu1 %v148_v26 }
 0x1e1   :  { %v240_v30 = vpop.f32.mrb[0].mxu1 }
 0x1e2   :  { %v241_v31 = vadd.f32 %v340_v0, %v240_v30  ;;  %v438_v32 = vpop.f32.mrb[1].mxu1 }
 0x1e4   :  { %456 = vmatmul.mubr.msk.f32.vlgmr.msra.gmra.mrb[2].mxu0 %vm259_vm1, %v241_v31 }
 0x2b7   :  { %v329_v34 = vpop.f32.mrb[2].mxu0 }
 0x2b8   :  { %v330_v35 = vadd.f32 %v341_v33, %v329_v34  ;;  %v457_v36 = vpop.f32.mrb[3].mxu0 }
 0x2ba   :  { %333 = vst [vmem:[%s723_s7] sm:$0xff] %v330_v35 }
 0x2bb   :  { %338 = vsyncpa [#allocation3], 1 }

</bundles_post_ra>
